<compile_context>
chip_gen: v7x
topology: tpu7x:2x2x1
jax: 0.10.0
libtpu: 0.0.40
codegen_flags: <defaults>
</compile_context>

<pallas_src>
import functools

import jax
import jax.numpy as jnp
from jax.experimental import pallas as pl
from jax.experimental.pallas import tpu as pltpu


# ---------------------------------------------------------------------------
# Fused kernel: LayerNorm stats + QKV + sigmoid attention + output projection
# ---------------------------------------------------------------------------
def fused_attention_kernel(
    x_ref, wqkv_ref, bqkv_ref, wout_ref, bout_ref, o_ref, attn_out_ref,
    *, bt, n, heads, dim_head, matmul_dtype,
):
    inner_dim = heads * dim_head
    dim = x_ref.shape[-1]
    m = bt * n

    # ---- LayerNorm statistics only; the affine is folded into w_qkv/bqkv ----
    x = x_ref[...].reshape(m, dim)                     # leading-dim merge, no relayout
    mu = jnp.mean(x, axis=-1, keepdims=True)
    var = jnp.mean((x - mu) ** 2, axis=-1, keepdims=True)
    xn = ((x - mu) * jax.lax.rsqrt(var + 1e-5)).astype(matmul_dtype)  # single cast

    # ---- QKV projection over the whole (bt*N, dim) slab ----
    # (gamma folded into wqkv rows; beta@W added here; scale folded into q cols)
    qkv = jnp.dot(xn, wqkv_ref[...], preferred_element_type=jnp.float32)
    qkv = (qkv + bqkv_ref[...]).astype(matmul_dtype)   # single lane-dense cast

    # ---- per-(batch, head) sigmoid attention into the VMEM scratch slab ----
    for bi in range(bt):                               # unrolled at trace time
        r0 = bi * n
        for h in range(heads):
            lo = h * dim_head
            q = qkv[r0:r0 + n, lo:lo + dim_head]                        # pre-scaled
            k = qkv[r0:r0 + n, inner_dim + lo:inner_dim + lo + dim_head]
            v = qkv[r0:r0 + n, 2 * inner_dim + lo:2 * inner_dim + lo + dim_head]

            # q @ k^T without materializing k.T: contract last dims on the MXU.
            dots = jax.lax.dot_general(
                q, k, (((1,), (1,)), ((), ())),
                preferred_element_type=jnp.float32,
            )                                                           # (N, N) f32
            attn = jax.nn.sigmoid(dots)                                 # self.attend
            attn_out_ref[r0:r0 + n, lo:lo + dim_head] = jnp.dot(
                attn.astype(matmul_dtype), v, preferred_element_type=jnp.float32
            )                                                           # (N, D) f32

    # ---- output projection (+ bias) over the whole slab ----
    out = attn_out_ref[...].astype(matmul_dtype)       # (bt*N, inner_dim), one cast
    res = jnp.dot(out, wout_ref[...], preferred_element_type=jnp.float32)
    res = res + bout_ref[...]
    o_ref[...] = res.reshape(bt, n, dim)               # leading-dim split, no relayout


# ---------------------------------------------------------------------------
# Wrapper
# ---------------------------------------------------------------------------
def _default_matmul_dtype():
    # bf16 operands (f32 accumulation) on v6e/v7x MXU; stay f32 elsewhere
    # (v5e has no bf16 VPU/EUP, extra cast passes are relatively pricier).
    try:
        kind = jax.devices()[0].device_kind.lower()
    except Exception:
        return jnp.float32
    if ("v6" in kind) or ("v7" in kind):
        return jnp.bfloat16
    return jnp.float32


def attention_forward(x, params, *, heads, dim_head, matmul_dtype=None,
                      block_b=None):
    B, N, dim = x.shape
    inner_dim = heads * dim_head
    scale = dim_head ** (-0.5)

    if matmul_dtype is None:
        matmul_dtype = _default_matmul_dtype()

    # How many batch elements per grid step: amortize per-step overhead, but
    # keep >=2 grid steps when possible so "parallel" shards across v7x's 2 TCs.
    if block_b is None:
        block_b = B // 2 if (B >= 2 and B % 2 == 0) else 1
    assert B % block_b == 0, "block_b must divide B"
    grid_b = B // block_b

    gamma = params["ln_gamma"].astype(jnp.float32)
    beta = params["ln_beta"].astype(jnp.float32)
    w_qkv = params["w_qkv"].astype(jnp.float32)
    w_out = params["w_out"].astype(jnp.float32)
    b_out = params["b_out"].astype(jnp.float32)

    # Fold LayerNorm affine + attention scale into the QKV weight/bias:
    #   (xn*gamma + beta) @ W == xn @ (diag(gamma) @ W) + beta @ W
    #   dots*scale == (scale*q) @ k^T  -> scale the q columns of BOTH terms.
    # (Folding before the bf16 cast rounds slightly differently than
    #  post-scaling would when scale isn't a power of two; here scale = 2^-2.)
    w_eff = gamma[:, None] * w_qkv                       # (dim, 3*inner_dim)
    b_eff = beta @ w_qkv                                 # (3*inner_dim,)
    col_scale = jnp.concatenate([
        jnp.full((inner_dim,), scale, jnp.float32),
        jnp.ones((2 * inner_dim,), jnp.float32)])
    w_eff = (w_eff * col_scale[None, :]).astype(matmul_dtype)
    b_eff = (b_eff * col_scale).reshape(1, 3 * inner_dim)      # stays f32
    w_out_c = w_out.astype(matmul_dtype)
    b_out_r = b_out.reshape(1, dim)                            # stays f32

    kernel = functools.partial(
        fused_attention_kernel,
        bt=block_b, n=N, heads=heads, dim_head=dim_head,
        matmul_dtype=matmul_dtype,
    )

    return pl.pallas_call(
        kernel,
        out_shape=jax.ShapeDtypeStruct((B, N, dim), jnp.float32),
        grid=(grid_b,),
        in_specs=[
            pl.BlockSpec((block_b, N, dim), lambda b: (b, 0, 0)),     # x
            pl.BlockSpec((dim, 3 * inner_dim), lambda b: (0, 0)),     # w_qkv (folded)
            pl.BlockSpec((1, 3 * inner_dim), lambda b: (0, 0)),       # qkv bias (folded)
            pl.BlockSpec((inner_dim, dim), lambda b: (0, 0)),         # w_out
            pl.BlockSpec((1, dim), lambda b: (0, 0)),                 # b_out
        ],
        out_specs=pl.BlockSpec((block_b, N, dim), lambda b: (b, 0, 0)),
        scratch_shapes=[pltpu.VMEM((block_b * N, inner_dim), jnp.float32)],
        compiler_params=pltpu.CompilerParams(
            dimension_semantics=("parallel",),
        ),
    )(x.astype(jnp.float32), w_eff, b_eff, w_out_c, b_out_r)


# ---------------------------------------------------------------------------
# Pure-JAX reference (mirrors the PyTorch forward exactly)
# ---------------------------------------------------------------------------
def attention_ref(x, params, *, heads, dim_head):
    B, N, dim = x.shape
    inner_dim = heads * dim_head
    scale = dim_head ** (-0.5)
    mu = jnp.mean(x, axis=-1, keepdims=True)
    var = jnp.mean((x - mu) ** 2, axis=-1, keepdims=True)
    xn = (x - mu) / jnp.sqrt(var + 1e-5) * params["ln_gamma"] + params["ln_beta"]
    qkv = xn @ params["w_qkv"]
    q, k, v = jnp.split(qkv, 3, axis=-1)

    def to_heads(t):
        return t.reshape(B, N, heads, dim_head).transpose(0, 2, 1, 3)

    q, k, v = to_heads(q), to_heads(k), to_heads(v)
    dots = jnp.einsum("bhnd,bhmd->bhnm", q, k) * scale
    attn = jax.nn.sigmoid(dots)
    out = jnp.einsum("bhnm,bhmd->bhnd", attn, v)
    out = out.transpose(0, 2, 1, 3).reshape(B, N, inner_dim)
    return out @ params["w_out"] + params["b_out"]


if __name__ == "__main__":
    # Small shapes consistent with the module.
    B, N, dim = 2, 8, 32
    heads, dim_head = 4, 16
    inner_dim = heads * dim_head

    key = jax.random.PRNGKey(0)
    kx, kg, kb, kq, ko, kob = jax.random.split(key, 6)

    x = jax.random.normal(kx, (B, N, dim), dtype=jnp.float32)

    # Deterministic parameters (shapes per the module's __init__); non-trivial
    # gamma/beta so the LN-affine folding is actually exercised.
    params = {
        "ln_gamma": 1.0 + 0.1 * jax.random.normal(kg, (dim,), jnp.float32),
        "ln_beta": 0.1 * jax.random.normal(kb, (dim,), jnp.float32),
        # to_qkv: Linear(dim, 3*inner_dim, bias=False); stored as (in, out)
        "w_qkv": jax.random.normal(kq, (dim, 3 * inner_dim), jnp.float32) * 0.05,
        # to_out: Linear(inner_dim, dim); stored as (in, out)
        "w_out": jax.random.normal(ko, (inner_dim, dim), jnp.float32) * 0.05,
        "b_out": jax.random.normal(kob, (dim,), jnp.float32) * 0.05,
    }

    y_ref = attention_ref(x, params, heads=heads, dim_head=dim_head)

    # f32 matmul operands: matches the reference to tight tolerance.
    y_f32 = attention_forward(x, params, heads=heads, dim_head=dim_head,
                              matmul_dtype=jnp.float32)
    jax.block_until_ready(y_f32)
    assert jnp.allclose(y_f32, y_ref, atol=1e-4, rtol=1e-4), \
        float(jnp.max(jnp.abs(y_f32 - y_ref)))

    # Auto dtype: bf16 operands + f32 accumulation on v6e/v7x, f32 elsewhere.
    y_auto = attention_forward(x, params, heads=heads, dim_head=dim_head)
    jax.block_until_ready(y_auto)
    assert float(jnp.max(jnp.abs(y_auto - y_ref))) < 5e-2

    print("KERNEL_OK")
</pallas_src>

<mosaic_0001>
module attributes {stable_mosaic.version = 11 : i64} {
  func.func @fused_attention_kernel(%arg0: i32, %arg1: memref<1x8x32xf32, #tpu.memory_space<vmem>>, %arg2: memref<32x192xf32, #tpu.memory_space<vmem>>, %arg3: memref<1x192xf32, #tpu.memory_space<vmem>>, %arg4: memref<64x32xf32, #tpu.memory_space<vmem>>, %arg5: memref<1x32xf32, #tpu.memory_space<vmem>>, %arg6: memref<1x8x32xf32, #tpu.memory_space<vmem>>, %arg7: memref<8x64xf32, #tpu.memory_space<vmem>>) attributes {dimension_semantics = [#tpu.dimension_semantics<parallel>], iteration_bounds = array<i64: 2>, scalar_prefetch = 0 : i64, scratch_operands = 1 : i64, tpu.core_type = #tpu.core_type<tc>, window_params = [{transform_indices = @transform_0, window_bounds = array<i64: 1, 8, 32>}, {pipeline_mode = #tpu.pipeline_mode<synchronous>, transform_indices = @transform_1, window_bounds = array<i64: 32, 192>}, {pipeline_mode = #tpu.pipeline_mode<synchronous>, transform_indices = @transform_2, window_bounds = array<i64: 1, 192>}, {pipeline_mode = #tpu.pipeline_mode<synchronous>, transform_indices = @transform_3, window_bounds = array<i64: 64, 32>}, {pipeline_mode = #tpu.pipeline_mode<synchronous>, transform_indices = @transform_4, window_bounds = array<i64: 1, 32>}, {transform_indices = @transform_5, window_bounds = array<i64: 1, 8, 32>}]} {
    %c0 = arith.constant 0 : index
    %c0_0 = arith.constant 0 : index
    %c0_1 = arith.constant 0 : index
    %0 = vector.load %arg1[%c0, %c0_0, %c0_1] : memref<1x8x32xf32, #tpu.memory_space<vmem>>, vector<1x8x32xf32>
    %1 = vector.shape_cast %0 : vector<1x8x32xf32> to vector<8x32xf32>
    %cst = arith.constant dense<0.000000e+00> : vector<8xf32>
    %2 = vector.multi_reduction <add>, %1, %cst [1] : vector<8x32xf32> to vector<8xf32>
    %3 = vector.shape_cast %2 : vector<8xf32> to vector<8x1xf32>
    %cst_2 = arith.constant 3.200000e+01 : f32
    %4 = vector.broadcast %cst_2 : f32 to vector<8x1xf32>
    %5 = arith.divf %3, %4 : vector<8x1xf32>
    %6 = vector.broadcast %5 : vector<8x1xf32> to vector<8x32xf32>
    %7 = arith.subf %1, %6 : vector<8x32xf32>
    %8 = arith.mulf %7, %7 : vector<8x32xf32>
    %cst_3 = arith.constant dense<0.000000e+00> : vector<8xf32>
    %9 = vector.multi_reduction <add>, %8, %cst_3 [1] : vector<8x32xf32> to vector<8xf32>
    %10 = vector.shape_cast %9 : vector<8xf32> to vector<8x1xf32>
    %cst_4 = arith.constant 3.200000e+01 : f32
    %11 = vector.broadcast %cst_4 : f32 to vector<8x1xf32>
    %12 = arith.divf %10, %11 : vector<8x1xf32>
    %13 = vector.broadcast %5 : vector<8x1xf32> to vector<8x32xf32>
    %14 = arith.subf %1, %13 : vector<8x32xf32>
    %cst_5 = arith.constant 9.99999974E-6 : f32
    %15 = vector.broadcast %cst_5 : f32 to vector<8x1xf32>
    %16 = arith.addf %12, %15 : vector<8x1xf32>
    %17 = math.rsqrt %16 : vector<8x1xf32>
    %18 = vector.broadcast %17 : vector<8x1xf32> to vector<8x32xf32>
    %19 = arith.mulf %14, %18 : vector<8x32xf32>
    %c0_6 = arith.constant 0 : index
    %c0_7 = arith.constant 0 : index
    %20 = vector.load %arg2[%c0_6, %c0_7] : memref<32x192xf32, #tpu.memory_space<vmem>>, vector<32x192xf32>
    %cst_8 = arith.constant dense<0.000000e+00> : vector<8x192xf32>
    %21 = tpu.matmul %19, %20, %cst_8 {dimension_numbers = #tpu.dot_dimension_numbers<[1], [0], [0], [1], [0, 0, 1, 1], [], []>} : vector<8x32xf32>, vector<32x192xf32>, vector<8x192xf32> -> vector<8x192xf32>
    %c0_9 = arith.constant 0 : index
    %c0_10 = arith.constant 0 : index
    %22 = vector.load %arg3[%c0_9, %c0_10] : memref<1x192xf32, #tpu.memory_space<vmem>>, vector<1x192xf32>
    %23 = vector.broadcast %22 : vector<1x192xf32> to vector<8x192xf32>
    %24 = arith.addf %21, %23 : vector<8x192xf32>
    %25 = vector.extract_strided_slice %24 {offsets = [0, 0], sizes = [8, 16], strides = [1, 1]} : vector<8x192xf32> to vector<8x16xf32>
    %26 = vector.extract_strided_slice %24 {offsets = [0, 64], sizes = [8, 16], strides = [1, 1]} : vector<8x192xf32> to vector<8x16xf32>
    %27 = vector.extract_strided_slice %24 {offsets = [0, 128], sizes = [8, 16], strides = [1, 1]} : vector<8x192xf32> to vector<8x16xf32>
    %cst_11 = arith.constant dense<0.000000e+00> : vector<8x8xf32>
    %28 = tpu.matmul %25, %26, %cst_11 {dimension_numbers = #tpu.dot_dimension_numbers<[1], [1], [0], [0], [0, 0, 1, 0], [], []>} : vector<8x16xf32>, vector<8x16xf32>, vector<8x8xf32> -> vector<8x8xf32>
    %29 = arith.negf %28 : vector<8x8xf32>
    %30 = math.exp %29 : vector<8x8xf32>
    %cst_12 = arith.constant 1.000000e+00 : f32
    %31 = vector.broadcast %cst_12 : f32 to vector<8x8xf32>
    %32 = arith.addf %31, %30 : vector<8x8xf32>
    %33 = arith.divf %31, %32 : vector<8x8xf32>
    %cst_13 = arith.constant dense<0.000000e+00> : vector<8x16xf32>
    %34 = tpu.matmul %33, %27, %cst_13 {dimension_numbers = #tpu.dot_dimension_numbers<[1], [0], [0], [1], [0, 0, 1, 1], [], []>} : vector<8x8xf32>, vector<8x16xf32>, vector<8x16xf32> -> vector<8x16xf32>
    %c0_14 = arith.constant 0 : index
    %c0_15 = arith.constant 0 : index
    %35 = vector.load %arg7[%c0_14, %c0_15] : memref<8x64xf32, #tpu.memory_space<vmem>>, vector<8x16xf32>
    tpu.vector_store %arg7[%c0_14, %c0_15], %34 {strides = array<i32>} : memref<8x64xf32, #tpu.memory_space<vmem>>, vector<8x16xf32>,
    %36 = vector.extract_strided_slice %24 {offsets = [0, 16], sizes = [8, 16], strides = [1, 1]} : vector<8x192xf32> to vector<8x16xf32>
    %37 = vector.extract_strided_slice %24 {offsets = [0, 80], sizes = [8, 16], strides = [1, 1]} : vector<8x192xf32> to vector<8x16xf32>
    %38 = vector.extract_strided_slice %24 {offsets = [0, 144], sizes = [8, 16], strides = [1, 1]} : vector<8x192xf32> to vector<8x16xf32>
    %cst_16 = arith.constant dense<0.000000e+00> : vector<8x8xf32>
    %39 = tpu.matmul %36, %37, %cst_16 {dimension_numbers = #tpu.dot_dimension_numbers<[1], [1], [0], [0], [0, 0, 1, 0], [], []>} : vector<8x16xf32>, vector<8x16xf32>, vector<8x8xf32> -> vector<8x8xf32>
    %40 = arith.negf %39 : vector<8x8xf32>
    %41 = math.exp %40 : vector<8x8xf32>
    %cst_17 = arith.constant 1.000000e+00 : f32
    %42 = vector.broadcast %cst_17 : f32 to vector<8x8xf32>
    %43 = arith.addf %42, %41 : vector<8x8xf32>
    %44 = arith.divf %42, %43 : vector<8x8xf32>
    %cst_18 = arith.constant dense<0.000000e+00> : vector<8x16xf32>
    %45 = tpu.matmul %44, %38, %cst_18 {dimension_numbers = #tpu.dot_dimension_numbers<[1], [0], [0], [1], [0, 0, 1, 1], [], []>} : vector<8x8xf32>, vector<8x16xf32>, vector<8x16xf32> -> vector<8x16xf32>
    %c0_19 = arith.constant 0 : index
    %c16 = arith.constant 16 : index
    %46 = vector.load %arg7[%c0_19, %c16] : memref<8x64xf32, #tpu.memory_space<vmem>>, vector<8x16xf32>
    tpu.vector_store %arg7[%c0_19, %c16], %45 {strides = array<i32>} : memref<8x64xf32, #tpu.memory_space<vmem>>, vector<8x16xf32>,
    %47 = vector.extract_strided_slice %24 {offsets = [0, 32], sizes = [8, 16], strides = [1, 1]} : vector<8x192xf32> to vector<8x16xf32>
    %48 = vector.extract_strided_slice %24 {offsets = [0, 96], sizes = [8, 16], strides = [1, 1]} : vector<8x192xf32> to vector<8x16xf32>
    %49 = vector.extract_strided_slice %24 {offsets = [0, 160], sizes = [8, 16], strides = [1, 1]} : vector<8x192xf32> to vector<8x16xf32>
    %cst_20 = arith.constant dense<0.000000e+00> : vector<8x8xf32>
    %50 = tpu.matmul %47, %48, %cst_20 {dimension_numbers = #tpu.dot_dimension_numbers<[1], [1], [0], [0], [0, 0, 1, 0], [], []>} : vector<8x16xf32>, vector<8x16xf32>, vector<8x8xf32> -> vector<8x8xf32>
    %51 = arith.negf %50 : vector<8x8xf32>
    %52 = math.exp %51 : vector<8x8xf32>
    %cst_21 = arith.constant 1.000000e+00 : f32
    %53 = vector.broadcast %cst_21 : f32 to vector<8x8xf32>
    %54 = arith.addf %53, %52 : vector<8x8xf32>
    %55 = arith.divf %53, %54 : vector<8x8xf32>
    %cst_22 = arith.constant dense<0.000000e+00> : vector<8x16xf32>
    %56 = tpu.matmul %55, %49, %cst_22 {dimension_numbers = #tpu.dot_dimension_numbers<[1], [0], [0], [1], [0, 0, 1, 1], [], []>} : vector<8x8xf32>, vector<8x16xf32>, vector<8x16xf32> -> vector<8x16xf32>
    %c0_23 = arith.constant 0 : index
    %c32 = arith.constant 32 : index
    %57 = vector.load %arg7[%c0_23, %c32] : memref<8x64xf32, #tpu.memory_space<vmem>>, vector<8x16xf32>
    tpu.vector_store %arg7[%c0_23, %c32], %56 {strides = array<i32>} : memref<8x64xf32, #tpu.memory_space<vmem>>, vector<8x16xf32>,
    %58 = vector.extract_strided_slice %24 {offsets = [0, 48], sizes = [8, 16], strides = [1, 1]} : vector<8x192xf32> to vector<8x16xf32>
    %59 = vector.extract_strided_slice %24 {offsets = [0, 112], sizes = [8, 16], strides = [1, 1]} : vector<8x192xf32> to vector<8x16xf32>
    %60 = vector.extract_strided_slice %24 {offsets = [0, 176], sizes = [8, 16], strides = [1, 1]} : vector<8x192xf32> to vector<8x16xf32>
    %cst_24 = arith.constant dense<0.000000e+00> : vector<8x8xf32>
    %61 = tpu.matmul %58, %59, %cst_24 {dimension_numbers = #tpu.dot_dimension_numbers<[1], [1], [0], [0], [0, 0, 1, 0], [], []>} : vector<8x16xf32>, vector<8x16xf32>, vector<8x8xf32> -> vector<8x8xf32>
    %62 = arith.negf %61 : vector<8x8xf32>
    %63 = math.exp %62 : vector<8x8xf32>
    %cst_25 = arith.constant 1.000000e+00 : f32
    %64 = vector.broadcast %cst_25 : f32 to vector<8x8xf32>
    %65 = arith.addf %64, %63 : vector<8x8xf32>
    %66 = arith.divf %64, %65 : vector<8x8xf32>
    %cst_26 = arith.constant dense<0.000000e+00> : vector<8x16xf32>
    %67 = tpu.matmul %66, %60, %cst_26 {dimension_numbers = #tpu.dot_dimension_numbers<[1], [0], [0], [1], [0, 0, 1, 1], [], []>} : vector<8x8xf32>, vector<8x16xf32>, vector<8x16xf32> -> vector<8x16xf32>
    %c0_27 = arith.constant 0 : index
    %c48 = arith.constant 48 : index
    %68 = vector.load %arg7[%c0_27, %c48] : memref<8x64xf32, #tpu.memory_space<vmem>>, vector<8x16xf32>
    tpu.vector_store %arg7[%c0_27, %c48], %67 {strides = array<i32>} : memref<8x64xf32, #tpu.memory_space<vmem>>, vector<8x16xf32>,
    %c0_28 = arith.constant 0 : index
    %c0_29 = arith.constant 0 : index
    %69 = vector.load %arg7[%c0_28, %c0_29] : memref<8x64xf32, #tpu.memory_space<vmem>>, vector<8x64xf32>
    %c0_30 = arith.constant 0 : index
    %c0_31 = arith.constant 0 : index
    %70 = vector.load %arg4[%c0_30, %c0_31] : memref<64x32xf32, #tpu.memory_space<vmem>>, vector<64x32xf32>
    %cst_32 = arith.constant dense<0.000000e+00> : vector<8x32xf32>
    %71 = tpu.matmul %69, %70, %cst_32 {dimension_numbers = #tpu.dot_dimension_numbers<[1], [0], [0], [1], [0, 0, 1, 1], [], []>} : vector<8x64xf32>, vector<64x32xf32>, vector<8x32xf32> -> vector<8x32xf32>
    %c0_33 = arith.constant 0 : index
    %c0_34 = arith.constant 0 : index
    %72 = vector.load %arg5[%c0_33, %c0_34] : memref<1x32xf32, #tpu.memory_space<vmem>>, vector<1x32xf32>
    %73 = vector.broadcast %72 : vector<1x32xf32> to vector<8x32xf32>
    %74 = arith.addf %71, %73 : vector<8x32xf32>
    %75 = vector.shape_cast %74 : vector<8x32xf32> to vector<1x8x32xf32>
    %c0_35 = arith.constant 0 : index
    %c0_36 = arith.constant 0 : index
    %c0_37 = arith.constant 0 : index
    %76 = vector.load %arg6[%c0_35, %c0_36, %c0_37] : memref<1x8x32xf32, #tpu.memory_space<vmem>>, vector<1x8x32xf32>
    tpu.vector_store %arg6[%c0_35, %c0_36, %c0_37], %75 {strides = array<i32>} : memref<1x8x32xf32, #tpu.memory_space<vmem>>, vector<1x8x32xf32>,
    return
  }
  func.func @transform_0(%arg0: i32) -> (i32, i32, i32) {
    %c0_i32 = arith.constant 0 : i32
    %c0_i32_0 = arith.constant 0 : i32
    %c0_i32_1 = arith.constant 0 : i32
    return %arg0, %c0_i32, %c0_i32_0 : i32, i32, i32
  }
  func.func @transform_1(%arg0: i32) -> (i32, i32) {
    %c0_i32 = arith.constant 0 : i32
    %c0_i32_0 = arith.constant 0 : i32
    %c0_i32_1 = arith.constant 0 : i32
    return %c0_i32, %c0_i32_0 : i32, i32
  }
  func.func @transform_2(%arg0: i32) -> (i32, i32) {
    %c0_i32 = arith.constant 0 : i32
    %c0_i32_0 = arith.constant 0 : i32
    %c0_i32_1 = arith.constant 0 : i32
    return %c0_i32, %c0_i32_0 : i32, i32
  }
  func.func @transform_3(%arg0: i32) -> (i32, i32) {
    %c0_i32 = arith.constant 0 : i32
    %c0_i32_0 = arith.constant 0 : i32
    %c0_i32_1 = arith.constant 0 : i32
    return %c0_i32, %c0_i32_0 : i32, i32
  }
  func.func @transform_4(%arg0: i32) -> (i32, i32) {
    %c0_i32 = arith.constant 0 : i32
    %c0_i32_0 = arith.constant 0 : i32
    %c0_i32_1 = arith.constant 0 : i32
    return %c0_i32, %c0_i32_0 : i32, i32
  }
  func.func @transform_5(%arg0: i32) -> (i32, i32, i32) {
    %c0_i32 = arith.constant 0 : i32
    %c0_i32_0 = arith.constant 0 : i32
    %c0_i32_1 = arith.constant 0 : i32
    return %arg0, %c0_i32, %c0_i32_0 : i32, i32, i32
  }
}

</mosaic_0001>

<bundles_post_ra>
// kernel: tpu_custom_call.1
= control target key start
LH: loop header
LB: loop body
LE: loop exit
PB: predicated region body
PF: predicated region fallthrough
CT: control target
= control target key end

     0   :  { %10 = vsyncpa [#allocation4], 0  ;;  %s1661_s0 = inlined_call_operand.vmem [shape: f32[2,8,32], index: 0, kind: input, shape index: {}]   ;;  %s1662_s1 = inlined_call_operand.vmem [shape: f32[32,192], index: 1, kind: input, shape index: {}]   ;;  %s1663_s2 = inlined_call_operand.vmem [shape: f32[1,192], index: 2, kind: input, shape index: {}]   ;;  %s1664_s3 = inlined_call_operand.vmem [shape: f32[64,32], index: 3, kind: input, shape index: {}]   ;;  %s1665_s4 = inlined_call_operand.vmem [shape: f32[1,32], index: 4, kind: input, shape index: {}]   ;;  %s1666_s5 = inlined_call_operand.hbm [shape: f32[2,8,32], index: 5, kind: output, shape index: {}]  }
   0x1   :  { %12 = vsyncpa [#allocation4 + $0x1], 0  ;;  %s1457_s18 = smov 0   ;;  %s1459_s19 = smov 0  }
   0x2   :  { %s1461_s20 = smov 0   ;;  %s1463_s21 = smov 0  }
   0x3 LB: > { %s1478_s22 = sadd.s32 4294967295, %s1414_s21   ;;  %s1152_s23 = sadd.s32 4294967294, %s1414_s21   ;;  %s1414_s21 = sphi %s1463_s21, %s1672_s21   ;;  %s1410_s20 = sphi %s1461_s20, %s1671_s20   ;;  %s1406_s19 = sphi %s1459_s19, %s1670_s19   ;;  %s1402_s18 = sphi %s1457_s18, %s1669_s18  }
   0x4   : > { %s1482_s24 = sadd.s32 1, %s1414_s21   ;;  %s135_s25 = sadd.s32 1, %s1410_s20 }
   0x5   : > { %s132_s26 = ssub.s32 %s1414_s21, %s1482_s24  ;;  %p145_p0 = scmp.ne.s32.totalorder %s1410_s20, %s1406_s19 }
   0x6   : > { %p133_p1 = scmp.eq.s32.totalorder %s132_s26, 0  ;;  %p146_p2 = scmp.eq.s32.totalorder %s1478_s22, 1 }
   0x7   : > { %p151_p3 = scmp.ne.s32.totalorder %s1406_s19, %s1402_s18  ;;  %p152_p4 = scmp.eq.s32.totalorder %s1152_s23, 1 }
   0x8   : > { %s1493_s27 = scalar_select %p133_p1, %s1410_s20, %s135_s25  }
   0x9   : > { %p1495_p5 = por %p146_p2, %p145_p0  ;;  %p1499_p6 = por %p152_p4, %p151_p3 }
   0xa   : > { %p1155_p7 = scmp.ge.s32.totalorder %s1414_s21, 1  ;;  %p189_p8 = scmp.lt.s32.totalorder %s1414_s21, 3 }
   0xc   : > { %p190_p9 = pnand %p1155_p7, %p189_p8 }
   0xd   : > { %p216_p10 = scmp.lt.s32.totalorder (!%p190_p9), %s1478_s22, 1  ;;  %vm221_vm0 = vcmask (!%p190_p9), 261120   ;;  %v237_v7 = vld [vmem:[%s1662_s1 + $0x8] sm:$0xff] (!%p190_p9)  ;;  %v239_v8 = vld [vmem:[%s1662_s1 + $0x18] sm:$0xff] (!%p190_p9)  ;;  %v236_v9 = vld [vmem:[%s1662_s1] sm:$0xff] (!%p190_p9)  ;;  %v1416_v14 = vmov (!%p190_p9), 0.0   ;;  %v246_v25 = vlaneseq (!%p190_p9) }
   0xe   : > { %193 = sbr.rel (%p190_p9) target bundleno = 1486 (0x5ce), region = 40  ;;  %v1265_v10 = vpack.c.bf16 (!%p190_p9), %v239_v8, %v237_v7  ;;  %v238_v11 = vld [vmem:[%s1662_s1 + $0x10] sm:$0xff] (!%p190_p9)  ;;  %v241_v12 = vld [vmem:[%s1662_s1 + $0x28] sm:$0xff] (!%p190_p9)  ;;  %v243_v13 = vld [vmem:[%s1662_s1 + $0x38] sm:$0xff] (!%p190_p9)  ;;  %323 = vmatprep.mubr.f32.mxu1 (!%p190_p9), %v1416_v14  ;;  %1216 = vmatprep.subr.mxu0 (!%p190_p9), %v1416_v14  ;;  %vm1417_vm1 = vmmov (!%p190_p9), 0   ;;  %s1418_s12 = smov (!%p190_p9), 112  }
   0xf   : > { %v1267_v15 = vpack.c.bf16 (!%p190_p9), %v238_v11, %v236_v9  ;;  %v1269_v16 = vpack.c.bf16 (!%p190_p9), %v243_v13, %v241_v12  ;;  %v240_v17 = vld [vmem:[%s1662_s1 + $0x20] sm:$0xff] (!%p190_p9)  ;;  %v242_v18 = vld [vmem:[%s1662_s1 + $0x30] sm:$0xff] (!%p190_p9)  ;;  %v247_v26 = vshrl.u32 (!%p190_p9), %v246_v25, 7  ;;  %1218 = vmatprep.mubr.msk.f32.mxu0 (!%p190_p9), %vm1417_vm1, %v1416_v14  ;;  %s1419_s13 = smov (!%p190_p9), 64   ;;  %s1420_s14 = smov (!%p190_p9), 80   ;;  %vm333_vm2 = vcmask (!%p190_p9), 130048  }
  0x10   : > { %1266 = vmatprep.subr.bf16.mxu1 (!%p190_p9), %v1265_v10  ;;  %v1271_v19 = vpack.c.bf16 (!%p190_p9), %v242_v18, %v240_v17  ;;  %v244_v28 = vld [vmem:[%s1663_s2] sm:$0x3] (!%p190_p9)  ;;  %s1421_s15 = smov (!%p190_p9), 48   ;;  %s1422_s16 = smov (!%p190_p9), 32   ;;  %vm414_vm3 = vcmask (!%p190_p9), 64512   ;;  %v990_v7 = vld [vmem:[%s1664_s3 + $0x8] sm:$0xff] (!%p190_p9) }
  0x11   : > { %1268 = vmatpush1.bf16.msra.mxu1 (!%p190_p9), %v1267_v15  ;;  %v248_v27 = vsub.s32 (!%p190_p9), 0, %v247_v26  ;;  %v252_v30 = vsub.s32 (!%p190_p9), 1, %v247_v26  ;;  %s1423_s17 = smov (!%p190_p9), 96   ;;  %s1424_s23 = smov (!%p190_p9), 16   ;;  %v991_v9 = vld [vmem:[%s1664_s3 + $0x10] sm:$0xff] (!%p190_p9)  ;;  %v992_v10 = vld [vmem:[%s1664_s3 + $0x18] sm:$0xff] (!%p190_p9) }
  0x12   : > { %1270 = vmatprep.subr.bf16.mxu1 (!%p190_p9), %v1269_v16  ;;  %v1425_v11 = vmov (!%p190_p9), 0.0|0.0   ;;  %v1277_v12 = vpack.c.bf16 (!%p190_p9), %v992_v10, %v991_v9  ;;  %v993_v16 = vld [vmem:[%s1664_s3 + $0x20] sm:$0xff] (!%p190_p9)  ;;  %v994_v17 = vld [vmem:[%s1664_s3 + $0x28] sm:$0xff] (!%p190_p9)  ;;  %vm654_vm4 = vcmask (!%p190_p9), 261248   ;;  %vm820_vm5 = vcmask (!%p190_p9), 392448  }
  0x13   : > { %v249_v29 = vrot.slane (!%p190_p9), %v244_v28, %v248_v27  ;;  %v253_v33 = vrot.slane (!%p190_p9), %v244_v28, %v252_v30  ;;  %vm986_vm6 = vcmask (!%p190_p9), 523648   ;;  %vm1004_vm7 = vcmask (!%p190_p9), 523264  }
  0x15   : > { %s217_s30 = scalar_select %p216_p10, %s1478_s22, 1  ;;  %1272 = vmatpush1.bf16.msra.mxu1 %v1271_v19  ;;  %v1280_v19 = vpack.c.bf16 %v994_v17, %v993_v16 }
  0x16   : > { %1206 = vmatprep.subr.mxu1 %v1416_v14 }
  0x17   : > { %s1157_s6 = sshll.u32 %s217_s30, 3 }
  0x18   : > { %s219_s9 = scalar_lea.vmem %s1661_s0, %s1157_s6 }
  0x19   : > { %v220_v0 = vld [vmem:[%s219_s9] sm:$0xff] }
  0x1a   : > { %v222_v1 = vsel %vm221_vm0, %v220_v0, 0.0 }
  0x1b   : > { %223 = vadd.xlane.f32.xlu0 %v222_v1 }
  0xa8   : > { %v224_v2 = vpop.xlane.xlu0 %223 }
  0xa9   : > { %v226_v3 = vmul.f32 0.03125, %v224_v2 }
  0xab   : > { %v227_v4 = vsub.f32 %v220_v0, %v226_v3 }
  0xad   : > { %v228_v5 = vmul.f32 %v227_v4, %v227_v4 }
  0xaf   : > { %v229_v6 = vsel %vm221_vm0, %v228_v5, 0.0 }
  0xb0   : > { %230 = vadd.xlane.f32.xlu0 %v229_v6  ;;  %v989_v6 = vld [vmem:[%s1664_s3] sm:$0xff] }
  0xb1   : > { %v1274_v8 = vpack.c.bf16 %v990_v7, %v989_v6 }
 0x13d   : > { %v231_v20 = vpop.xlane.xlu0 %230 }
 0x13e   : > { %v232_v21 = vmul.f32 0.03125, %v231_v20  ;;  %v995_v20 = vld [vmem:[%s1664_s3 + $0x30] sm:$0xff] }
 0x140   : > { %v233_v22 = vadd.f32 1e-05, %v232_v21  ;;  %v996_v21 = vld [vmem:[%s1664_s3 + $0x38] sm:$0xff] }
 0x142   : > { %1334 = vrsqrt.f32 %v233_v22  ;;  %v1283_v22 = vpack.c.bf16 %v996_v21, %v995_v20 }
 0x14c   : > { %v1335_v23 = vpop.eup %1334 }
 0x14d   : > { %v235_v24 = vmul.f32 %v1335_v23, %v227_v4 }
 0x14f   : > { %1158 = vmatmul.mubr.msk.f32.vlgmr.msra.gmra.mrb[0].mxu1 %vm221_vm0, %v235_v24 }
 0x150   : > { %1208 = vmatprep.mubr.msk.f32.mxu1 %vm1417_vm1, %v1416_v14 }
 0x222   : > { %v325_v31 = vpop.f32.mrb[0].mxu1 }
 0x223   : > { %v326_v32 = vadd.f32 %v325_v31, %v249_v29  ;;  %v327_v34 = vpop.f32.mrb[1].mxu1  ;;  %v1175_v31 = vld [vmem:[%s1665_s4] ss:$0 sm:$0xff] }
 0x224   : > { %v328_v35 = vadd.f32 %v327_v34, %v253_v33 }
 0x225   : > { %489 = vrot.lane.b32.xlu0 %v326_v32, %s1418_s12  ;;  %331 = vrot.lane.b32.xlu1 %v326_v32, %s1419_s13 }
 0x229   : > { %906 = vrot.lane.b32.xlu0 %v328_v35, %s1420_s14  ;;  %491 = vrot.lane.b32.xlu1 %v326_v32, %s1421_s15 }
 0x22d   : > { %658 = vrot.lane.b32.xlu1 %v326_v32, %s1422_s16 }
 0x231   : > { %656 = vrot.lane.b32.xlu1 %v326_v32, %s1423_s17 }
 0x235   : > { %824 = vrot.lane.b32.xlu1 %v326_v32, %s1424_s23 }
 0x239   : > { %822 = vrot.lane.b32.xlu1 %v326_v32, %s1420_s14 }
 0x23d   : > { %574 = vrot.lane.b32.xlu1 %v328_v35, %s1418_s12 }
 0x241   : > { %740 = vrot.lane.b32.xlu1 %v328_v35, %s1423_s17 }
 0x297   : > { %v332_v36 = vpop.permute.xlu1 %331  ;;  %v490_v38 = vpop.permute.xlu0 %489 }
 0x298   : > { %1207 = vmatpush3.xpose.msk.msra.mxu1 %vm333_vm2, %v332_v36 }
 0x299   : > { %1211 = vmatprep.subr.mxu1 %v1416_v14 }
 0x29b   : > { %1209 = vmatmul.mubr.msk.f32.vlgmr.msra.gmra.mrb[2].mxu1 %vm333_vm2, %v326_v32  ;;  %v492_v37 = vpop.permute.xlu1 %491  ;;  %v907_v4 = vpop.permute.xlu0 %906 }
 0x29c   : > { %1212 = vmatpush3.msra.mxu1 %v328_v35  ;;  %1217 = vmatpush3.xpose.msk.msra.mxu0 %vm333_vm2, %v492_v37 }
 0x29d   : > { %1226 = vmatprep.subr.mxu0 %v1416_v14  ;;  %1213 = vmatprep.mubr.msk.f32.mxu1 %vm1417_vm1, %v1416_v14 }
 0x29e   : > { %1221 = vmatprep.subr.mxu1 %v1416_v14 }
 0x29f   : > { %1219 = vmatmul.mubr.msk.f32.vlgmr.msra.gmra.mrb[0].mxu0 %vm333_vm2, %v490_v38  ;;  %v659_v39 = vpop.permute.xlu1 %658 }
 0x2a0   : > { %1227 = vmatpush3.xpose.msk.msra.mxu0 %vm333_vm2, %v659_v39  ;;  %1228 = vmatprep.mubr.msk.f32.mxu0 %vm1417_vm1, %v1416_v14 }
 0x2a1   : > { %1236 = vmatprep.subr.mxu0 %v1416_v14 }
 0x2a3   : > { %v657_v40 = vpop.permute.xlu1 %656 }
 0x2a4   : > { %1229 = vmatmul.mubr.msk.f32.vlgmr.msra.gmra.mrb[2].mxu0 %vm333_vm2, %v657_v40 }
 0x2a5   : > { %1238 = vmatprep.mubr.msk.f32.mxu0 %vm1417_vm1, %v1416_v14 }
 0x2a7   : > { %v825_v41 = vpop.permute.xlu1 %824 }
 0x2a8   : > { %1237 = vmatpush3.xpose.msk.msra.mxu0 %vm333_vm2, %v825_v41 }
 0x2a9   : > { %1273 = vmatprep.subr.bf16.mxu0 %v1425_v11 }
 0x2ab   : > { %v823_v42 = vpop.permute.xlu1 %822 }
 0x2ac   : > { %1239 = vmatmul.mubr.msk.f32.vlgmr.msra.gmra.mrb[4].mxu0 %vm333_vm2, %v823_v42 }
 0x2ad   : > { %1262 = vmatprep.mubr.msk.f32.mxu0 %vm1417_vm1, %v1416_v14  ;;  %1275 = vmatpush3.bf16.msra.mxu0 %v1274_v8 }
 0x2ae   : > { %1276 = vmatprep.subr.bf16.mxu0 %v1425_v11 }
 0x2af   : > { %v575_v61 = vpop.permute.xlu1 %574 }
 0x2b1   : > { %1278 = vmatpush3.bf16.msra.mxu0 %v1277_v12 }
 0x2b2   : > { %1279 = vmatprep.subr.bf16.mxu0 %v1425_v11 }
 0x2b3   : > { %v741_v1 = vpop.permute.xlu1 %740 }
 0x2b5   : > { %1281 = vmatpush3.bf16.msra.mxu0 %v1280_v19 }
 0x2b6   : > { %1282 = vmatprep.subr.bf16.mxu0 %v1425_v11 }
 0x2b9   : > { %1284 = vmatpush3.bf16.msra.mxu0 %v1283_v22 }
 0x36e   : > { %v404_v43 = vpop.f32.mrb[2].mxu1 }
 0x36f   : > { %v1161_v44 = vmul.f32 -1.442695, %v404_v43  ;;  %v1210_v45 = vpop.f32.mrb[3].mxu1 }
 0x371   : > { %1336 = vpow2.f32 %v1161_v44 }
 0x372   : > { %v563_v46 = vpop.f32.mrb[0].mxu0 }
 0x373   : > { %v1165_v47 = vmul.f32 -1.442695, %v563_v46  ;;  %v1220_v48 = vpop.f32.mrb[1].mxu0 }
 0x375   : > { %1338 = vpow2.f32 %v1165_v47 }
 0x377   : > { %v730_v49 = vpop.f32.mrb[2].mxu0 }
 0x378   : > { %v1169_v50 = vmul.f32 -1.442695, %v730_v49  ;;  %v1230_v51 = vpop.f32.mrb[3].mxu0 }
 0x37a   : > { %1340 = vpow2.f32 %v1169_v50 }
 0x37b   : > { %v1337_v52 = vpop.eup %1336 }
 0x37c   : > { %v411_v53 = vadd.f32 1.0, %v1337_v52 }
 0x37e   : > { %1342 = vrcp.f32 %v411_v53 }
 0x37f   : > { %v1339_v54 = vpop.eup %1338  ;;  %v896_v55 = vpop.f32.mrb[4].mxu0 }
 0x380   : > { %v570_v56 = vadd.f32 1.0, %v1339_v54  ;;  %v1173_v57 = vmul.f32 -1.442695, %v896_v55  ;;  %v1240_v58 = vpop.f32.mrb[5].mxu0 }
 0x382   : > { %1344 = vrcp.f32 %v570_v56 }
 0x383   : > { %1346 = vpow2.f32 %v1173_v57 }
 0x384   : > { %v1341_v59 = vpop.eup %1340 }
 0x385   : > { %v737_v60 = vadd.f32 1.0, %v1341_v59 }
 0x387   : > { %1348 = vrcp.f32 %v737_v60 }
 0x388   : > { %v1343_v62 = vpop.eup %1342 }
 0x389   : > { %1214 = vmatmul.mubr.msk.f32.vlgmr.msra.gmra.mrb[4].mxu1 %vm414_vm3, %v1343_v62 }
 0x38a   : > { %1222 = vmatpush3.msra.mxu1 %v575_v61  ;;  %1223 = vmatprep.mubr.msk.f32.mxu1 %vm1417_vm1, %v1416_v14 }
 0x38b   : > { %1231 = vmatprep.subr.mxu1 %v1416_v14 }
 0x38c   : > { %v1345_v63 = vpop.eup %1344 }
 0x38d   : > { %v1347_v0 = vpop.eup %1346  ;;  %1224 = vmatmul.mubr.msk.f32.vlgmr.msra.gmra.mrb[6].mxu1 %vm414_vm3, %v1345_v63 }
 0x38e   : > { %v903_v2 = vadd.f32 1.0, %v1347_v0  ;;  %1232 = vmatpush3.msra.mxu1 %v741_v1  ;;  %1233 = vmatprep.mubr.msk.f32.mxu1 %vm1417_vm1, %v1416_v14 }
 0x38f   : > { %1241 = vmatprep.subr.mxu1 %v1416_v14 }
 0x390   : > { %1350 = vrcp.f32 %v903_v2 }
 0x391   : > { %v1349_v3 = vpop.eup %1348 }
 0x392   : > { %1234 = vmatmul.mubr.msk.f32.vlgmr.msra.gmra.mrb[8].mxu1 %vm414_vm3, %v1349_v3 }
 0x393   : > { %1242 = vmatpush3.msra.mxu1 %v907_v4  ;;  %1243 = vmatprep.mubr.msk.f32.mxu1 %vm1417_vm1, %v1416_v14 }
 0x39a   : > { %v1351_v5 = vpop.eup %1350 }
 0x39b   : > { %1244 = vmatmul.mubr.msk.f32.vlgmr.msra.gmra.mrb[10].mxu1 %vm414_vm3, %v1351_v5 }
 0x45c   : > { %v484_v13 = vpop.f32.mrb[4].mxu1 }
 0x45d   : > { %488 = vst.msk [vmem:[#allocation2] sm:$0xff] %vm333_vm2, %v484_v13  ;;  %v1215_v14 = vpop.f32.mrb[5].mxu1 }
 0x460   : > { %v646_v15 = vpop.f32.mrb[6].mxu1 }
 0x461   : > { %651 = vrot.lane.b32.xlu1 %v646_v15, %s1424_s23  ;;  %v1225_v18 = vpop.f32.mrb[7].mxu1 }
 0x465   : > { %v812_v23 = vpop.f32.mrb[8].mxu1 }
 0x466   : > { %817 = vrot.lane.b32.xlu0 %v812_v23, %s1422_s16  ;;  %v1235_v24 = vpop.f32.mrb[9].mxu1  ;;  %s213_s16 = sand.u32 1, %s1406_s19  }
 0x467   : > { %s1156_s23 = sshll.u32 %s213_s16, 3  ;;  %s1080_s13 = scalar_lea.sflag [#allocation4], %s213_s16 }
 0x468   : > { %s215_s8 = scalar_lea.vmem [#allocation3], %s1156_s23 }
 0x469   : > { %s1093_s9 = sshll.u32 %s215_s8, 4  ;;  %s1620_s9 = int_to_ptr.vmem [resolvable:$true] %s1093_s9 }
 0x46a   : > { %s1352_s14 = scalar_lea.vmem %s1620_s9, 128 }
 0x46b   : > { %p1353_p11 = scmp.ne.s32.totalorder %s1620_s9, %s1352_s14 }
 0x46d   : > { %p1354_p12 = pnand %p1353_p11, %p1495_p5 }
 0x46e   : > { %v978_v25 = vpop.f32.mrb[10].mxu1 }
 0x46f   : > { %983 = vrot.lane.b32.xlu1 %v978_v25, %s1421_s15  ;;  %v1245_v26 = vpop.f32.mrb[11].mxu1  ;;  %s1178_s15 = sshll.u32 %s1478_s22, 7  ;;  %p1355_p13 = pneg %p1354_p12 }
 0x470   : > { %s1618_s12 = scalar_lea.hbm %s1666_s5, %s1178_s15  ;;  %s1426_s22 = smov [#allocation3]  }
 0x471   : > { %s1356_s17 = sshll.u32 %s1426_s22, 4  ;;  %s1357_s17 = int_to_ptr.vmem [resolvable:$false] %s1356_s17 }
 0x472   : > { %s1358_s25 = scalar_lea.vmem %s1357_s17, 256  ;;  %p1359_p0 = scmp.lt.s32.totalorder %s1620_s9, %s1357_s17 }
 0x473   : > { %p1360_p1 = scmp.lt.s32.totalorder %s1358_s25, %s1352_s14 }
 0x475   : > { %p1361_p2 = por %p1360_p1, %p1359_p0 }
 0x477   : > { %p1362_p3 = pnand %p1361_p2, %p1355_p13 }
 0x4d3   : > { %v652_v27 = vpop.permute.xlu1 %651 }
 0x4d4   : > { %655 = vst.msk [vmem:[#allocation2] sm:$0xff] %vm654_vm4, %v652_v27 }
 0x4d8   : > { %v818_v28 = vpop.permute.xlu0 %817 }
 0x4d9   : > { %821 = vst.msk [vmem:[#allocation2] sm:$0xff] %vm820_vm5, %v818_v28 }
 0x4e1   : > { %v984_v29 = vpop.permute.xlu1 %983 }
 0x4e2   : > { %987 = vst.msk [vmem:[#allocation2] sm:$0xff] %vm986_vm6, %v984_v29 }
 0x4e9   : > { %v988_v30 = vld [vmem:[#allocation2] sm:$0xff] }
 0x4ea   : > { %1263 = vmatmul.mubr.msk.f32.vlgmr.msra.gmra.mrb[6].mxu0 %vm1004_vm7, %v988_v30 }
 0x5bd   : > { %v1074_v32 = vpop.f32.mrb[6].mxu0 }
 0x5be   : > { %v1075_v33 = vadd.f32 %v1175_v31, %v1074_v32  ;;  %v1264_v34 = vpop.f32.mrb[7].mxu0 }
 0x5c0   : > { %1078 = vst.msk [vmem:[%s215_s8] sm:$0xff] %vm221_vm0, %v1075_v33 }
 0x5c1   : > { %1365 = shalt.err (!%p1362_p3)
}
 0x5c2   : > { %s1366_s26 = scalar_lea.hbm %s1618_s12, 128  ;;  %s1370_s23 = scalar_lea.hbm %s1666_s5, 256 }
 0x5c3   : > { %p1367_p4 = scmp.ne.s32.totalorder %s1618_s12, %s1366_s26  ;;  %p1371_p9 = scmp.lt.u32.totalorder %s1618_s12, %s1666_s5 }
 0x5c4   : > { %p1372_p10 = scmp.lt.u32.totalorder %s1370_s23, %s1366_s26  ;;  %p1374_p12 = scmp.lt.u32.totalorder %s1366_s26, %s1618_s12 }
 0x5c5   : > { %p1368_p7 = pnand %p1367_p4, %p1495_p5 }
 0x5c6   : > { %p1373_p11 = por %p1372_p10, %p1371_p9 }
 0x5c7   : > { %p1369_p8 = pneg %p1368_p7 }
 0x5c8   : > { %p1375_p13 = por %p1374_p12, %p1373_p11 }
 0x5ca   : > { %p1376_p0 = pnand %p1375_p13, %p1369_p8 }
 0x5cc   : > { %1379 = shalt.err (!%p1376_p0)
}
 0x5cd   : > { %1285 = dma.vmem_to_hbm [thread:$0]  (%p1495_p5), %s1620_s9, 128, %s1618_s12, %s1080_s13  }
 0x5ce PF: > { %p1291_p1 = scmp.ge.s32.totalorder %s1414_s21, 2  ;;  %s1105_s15 = sand.u32 1, %s1402_s18  }
 0x5cf   : > { %s1106_s8 = scalar_lea.sflag [#allocation4], %s1105_s15 }
 0x5d0   : > { %p1288_p2 = pnand %p1291_p1, %p1499_p6 }
 0x5d2   : > { %1397 = dma.done.wait (!%p1288_p2), %s1106_s8, 128  }
 0x5d3   : > { %1399 = vsyncadd (!%p1288_p2), %s1106_s8, 4294967168  ;;  %p15_p3 = scmp.ge.s32.totalorder %s1482_s24, 4   ;;  %s1669_s18 = smov %s1406_s19 }
 0x5d4   : > { %s1670_s19 = smov %s1410_s20  ;;  %s1671_s20 = smov %s1493_s27 }
 0x5d5   : > { %s1672_s21 = smov %s1482_s24  ;;  %17 = sbr.rel (!%p15_p3) target bundleno = 3 (0x3), region = 75 }
 0x5dc   :  { %1111 = vsyncpa [#allocation4], 1 }
 0x5dd   :  { %1113 = vsyncpa [#allocation4 + $0x1], 1 }

</bundles_post_ra>
